<compile_context>
chip_gen: v7x
topology: tpu7x:2x2x1
jax: 0.10.0
libtpu: 0.0.40
codegen_flags: <defaults>
</compile_context>

<pallas_src>
import jax
import jax.numpy as jnp
from jax.experimental import pallas as pl
from jax.experimental.pallas import tpu as pltpu


# --------------------------------------------------------------------------- #
# Small host-side helpers
# --------------------------------------------------------------------------- #

def _round_up(a, m):
    return (a + m - 1) // m * m


def _vmem_budget_bytes():
    """Conservative per-kernel VMEM budget (v7x has 64 MiB physical, v5e 16 MiB scoped default)."""
    try:
        info_fn = getattr(pltpu, "get_tpu_info", None)
        if info_fn is not None:
            cap = getattr(info_fn(), "vmem_capacity_bytes", None)
            if cap:
                return (int(cap) * 3) // 4
    except Exception:
        pass
    return 48 << 20  # safe default: below v7x's 64 MiB physical VMEM


def _tensorcore_count():
    """Best-effort TensorCore count (2 on v7x, 1 on v5e/v6e)."""
    try:
        info_fn = getattr(pltpu, "get_tpu_info", None)
        if info_fn is not None:
            info = info_fn()
            for attr in ("num_cores", "tensorcore_count", "num_tensorcores"):
                v = getattr(info, attr, None)
                if v:
                    return int(v)
    except Exception:
        pass
    try:
        kind = getattr(jax.devices()[0], "device_kind", "") or ""
        if "7" in kind:   # e.g. "TPU v7x"
            return 2
    except Exception:
        pass
    return 1


def _grid_invariant_spec(block_shape, index_map):
    """Grid-invariant block: single-buffered (no wasted duplicate copy in VMEM)."""
    try:
        return pl.BlockSpec(block_shape, index_map, pipeline_mode=pl.Buffered(1))
    except Exception:
        # Older jax without pipeline_mode / Buffered: fall back to default buffering.
        return pl.BlockSpec(block_shape, index_map)


def _choose_tile_n(N, row_in, row_out, itemsize, weight_bytes, budget, num_cores):
    """Largest slab-tile that fits VMEM (double-buffered x/out + single-buffered weights)."""
    n_ceil8 = _round_up(max(N, 1), 8)
    headroom = 2 << 20
    avail = budget - weight_bytes - headroom
    per_row = 2 * (row_in + row_out) * itemsize   # x + out, double buffered
    if avail <= per_row * 8:
        tile = 8
    else:
        tile = min(n_ceil8, (avail // per_row) // 8 * 8, 2048)
    if num_cores > 1 and N > 8:
        # Force >=2 grid steps so the "parallel" axis shards across both TensorCores (v7x).
        tile = min(tile, _round_up(-(-N // num_cores), 8))
    return max(8, int(tile))


# --------------------------------------------------------------------------- #
# Kernels
# --------------------------------------------------------------------------- #

def _fused_patch_map_kernel(x_ref, wkt_ref, bias_ref, o_ref):
    # x_ref:    (TN, P)       flattened input slabs, P = p1*p2
    # wkt_ref:  (P, QD_pad)   kron(W1, W2)^T, grid-invariant, single-buffered
    # bias_ref: (1, QD_pad)   fused bias (f32), grid-invariant, single-buffered
    # o_ref:    (TN, QD_pad)  flattened output slabs (lane-dense, QD_pad % 128 == 0)
    acc = jnp.dot(x_ref[...], wkt_ref[...], preferred_element_type=jnp.float32)
    o_ref[...] = (acc + bias_ref[...]).astype(o_ref.dtype)


def _two_stage_patch_map_kernel(x_ref, w1_ref, w2t_ref, b1_ref, b2_ref, o_ref):
    # Fallback for configs where the (P, Q*D) kron weight would not fit VMEM.
    # x_ref:   (TN, p1, p2)
    # w1_ref:  (Q, p1)   grid-invariant
    # w2t_ref: (p2, D)   grid-invariant
    # b1_ref:  (Q, 1)    f32
    # b2_ref:  (1, D)    f32
    # o_ref:   (TN, Q, D)
    tn = x_ref.shape[0]
    w1 = w1_ref[...]
    w2t = w2t_ref[...]
    b1 = b1_ref[...]
    b2 = b2_ref[...]

    @pl.loop(0, tn)
    def _(n):
        h = jnp.dot(w1, x_ref[n], preferred_element_type=jnp.float32) + b1      # (Q, p2)
        y = jnp.dot(h.astype(w2t.dtype), w2t,
                    preferred_element_type=jnp.float32) + b2                    # (Q, D)
        o_ref[n] = y.astype(o_ref.dtype)


# --------------------------------------------------------------------------- #
# Parameter preparation (hoisted out of the per-call hot path)
# --------------------------------------------------------------------------- #

def prepare_patch_map_params(w1, b1, w2, b2, *, compute_dtype=None):
    """Fuse the two Linears into one (P, QD_pad) matrix + bias.

    Call ONCE per parameter set (e.g. at init) and reuse across forward calls.
    compute_dtype: optionally bfloat16 to halve weight/input DMA bytes (f32 accumulate).
    """
    Q, p1 = w1.shape
    D, p2 = w2.shape
    P = p1 * p2
    QD = Q * D
    QD_pad = _round_up(QD, 128)          # keep the output store lane-dense
    cdt = compute_dtype if compute_dtype is not None else w1.dtype

    w1f = w1.astype(jnp.float32)
    w2f = w2.astype(jnp.float32)
    wk_t = jnp.kron(w1f, w2f).T                                           # (P, QD)
    bias = (b1.astype(jnp.float32)[:, None] * jnp.sum(w2f, axis=1)[None, :]
            + b2.astype(jnp.float32)[None, :]).reshape(1, QD)             # (1, QD)
    if QD_pad != QD:
        wk_t = jnp.pad(wk_t, ((0, 0), (0, QD_pad - QD)))
        bias = jnp.pad(bias, ((0, 0), (0, QD_pad - QD)))
    wk_t = wk_t.astype(cdt)

    return dict(wk_t=wk_t, bias=bias, Q=Q, D=D, p1=p1, p2=p2,
                P=P, QD=QD, QD_pad=QD_pad)


# --------------------------------------------------------------------------- #
# Wrappers
# --------------------------------------------------------------------------- #

def mlp_patch_map_fused(x, params, *, tile_n=None):
    """Hot path: x (B, C, p1, p2) -> (B, C, Q, D) using precomputed fused params."""
    B, C, p1, p2 = x.shape
    Q, D = params["Q"], params["D"]
    P, QD, QD_pad = params["P"], params["QD"], params["QD_pad"]
    wk_t, bias = params["wk_t"], params["bias"]
    N = B * C

    x_flat = x.reshape(N, P).astype(wk_t.dtype)

    itemsize = jnp.dtype(wk_t.dtype).itemsize
    budget = _vmem_budget_bytes()
    weight_bytes = P * QD_pad * itemsize + QD_pad * 4
    if tile_n is None:
        tile_n = _choose_tile_n(N, P, QD_pad, itemsize, weight_bytes,
                                budget, _tensorcore_count())
    n_tiles = pl.cdiv(N, tile_n)
    n_pad = n_tiles * tile_n
    if n_pad != N:
        x_flat = jnp.pad(x_flat, ((0, n_pad - N), (0, 0)))

    out_itemsize = jnp.dtype(x.dtype).itemsize
    cost = pl.CostEstimate(
        flops=2 * n_pad * P * QD_pad,
        transcendentals=0,
        bytes_accessed=itemsize * (n_pad * P + P * QD_pad)
        + 4 * QD_pad + out_itemsize * n_pad * QD_pad,
    )

    out_flat = pl.pallas_call(
        _fused_patch_map_kernel,
        out_shape=jax.ShapeDtypeStruct((n_pad, QD_pad), x.dtype),
        grid=(n_tiles,),
        in_specs=[
            pl.BlockSpec((tile_n, P), lambda i: (i, 0)),
            _grid_invariant_spec((P, QD_pad), lambda i: (0, 0)),
            _grid_invariant_spec((1, QD_pad), lambda i: (0, 0)),
        ],
        out_specs=pl.BlockSpec((tile_n, QD_pad), lambda i: (i, 0)),
        compiler_params=pltpu.CompilerParams(
            dimension_semantics=("parallel",),
            vmem_limit_bytes=int(budget)),
        cost_estimate=cost,
    )(x_flat, wk_t, bias)

    out = out_flat
    if n_pad != N:
        out = out[:N]
    if QD_pad != QD:
        out = out[:, :QD]
    return out.reshape(B, C, Q, D)


def mlp_patch_map_two_stage(x, w1, b1, w2, b2, *, tile_n=None):
    """Fallback: two in-kernel matmuls per slab (used when the kron weight won't fit VMEM)."""
    B, C, p1, p2 = x.shape
    Q = w1.shape[0]
    D = w2.shape[0]
    N = B * C

    x3 = x.reshape(N, p1, p2)
    w2t = w2.T
    b1c = b1.reshape(Q, 1).astype(jnp.float32)
    b2c = b2.reshape(1, D).astype(jnp.float32)

    itemsize = jnp.dtype(x.dtype).itemsize
    budget = _vmem_budget_bytes()
    weight_bytes = (Q * p1 + p2 * D + Q + D) * 4
    if tile_n is None:
        tile_n = _choose_tile_n(N, p1 * p2, Q * D, itemsize, weight_bytes,
                                budget, _tensorcore_count())
    n_tiles = pl.cdiv(N, tile_n)
    n_pad = n_tiles * tile_n
    if n_pad != N:
        x3 = jnp.pad(x3, ((0, n_pad - N), (0, 0), (0, 0)))

    cost = pl.CostEstimate(
        flops=2 * n_pad * (Q * p1 * p2 + Q * p2 * D),
        transcendentals=0,
        bytes_accessed=itemsize * (n_pad * p1 * p2 + Q * p1 + p2 * D + n_pad * Q * D),
    )

    out3 = pl.pallas_call(
        _two_stage_patch_map_kernel,
        out_shape=jax.ShapeDtypeStruct((n_pad, Q, D), x.dtype),
        grid=(n_tiles,),
        in_specs=[
            pl.BlockSpec((tile_n, p1, p2), lambda i: (i, 0, 0)),
            _grid_invariant_spec((Q, p1), lambda i: (0, 0)),
            _grid_invariant_spec((p2, D), lambda i: (0, 0)),
            _grid_invariant_spec((Q, 1), lambda i: (0, 0)),
            _grid_invariant_spec((1, D), lambda i: (0, 0)),
        ],
        out_specs=pl.BlockSpec((tile_n, Q, D), lambda i: (i, 0, 0)),
        compiler_params=pltpu.CompilerParams(
            dimension_semantics=("parallel",),
            vmem_limit_bytes=int(budget)),
        cost_estimate=cost,
    )(x3, w1, w2t, b1c, b2c)

    if n_pad != N:
        out3 = out3[:N]
    return out3.reshape(B, C, Q, D)


def mlp_patch_map(x, w1, b1, w2, b2, *, tile_n=None, compute_dtype=None,
                  force_two_stage=False):
    """One-shot convenience (prep + call). For repeated forward passes, call
    prepare_patch_map_params() once and use mlp_patch_map_fused() directly."""
    Q, p1 = w1.shape
    D, p2 = w2.shape
    P = p1 * p2
    QD_pad = _round_up(Q * D, 128)
    itemsize = jnp.dtype(compute_dtype if compute_dtype is not None else x.dtype).itemsize
    budget = _vmem_budget_bytes()
    kron_bytes = P * QD_pad * itemsize
    # VMEM gate for the Kronecker fusion (matters on v7x 64 MiB / v5e 16 MiB scoped).
    if force_two_stage or kron_bytes > budget // 2:
        return mlp_patch_map_two_stage(x, w1, b1, w2, b2, tile_n=tile_n)
    params = prepare_patch_map_params(w1, b1, w2, b2, compute_dtype=compute_dtype)
    return mlp_patch_map_fused(x, params, tile_n=tile_n)


def reference(x, w1, b1, w2, b2):
    # Plain-JAX replica of the PyTorch fc stack for verification.
    xt = jnp.swapaxes(x, -1, -2)                      # (B, C, p2, p1)
    h = jnp.einsum('bcji,qi->bcjq', xt, w1) + b1      # (B, C, p2, Q)
    h = jnp.swapaxes(h, -1, -2)                       # (B, C, Q, p2)
    y = jnp.einsum('bcqj,dj->bcqd', h, w2) + b2       # (B, C, Q, D)
    return y


if __name__ == "__main__":
    # Module config (ablation=False):
    patch_size = (4, 2)
    context_length = 16
    prediction_length = 8
    input_size = 16
    B, C = 2, 4

    p1 = context_length // patch_size[0]   # 4
    p2 = input_size // patch_size[1]       # 8

    key = jax.random.PRNGKey(0)
    kx, k1, k2, k3, k4 = jax.random.split(key, 5)

    x = jax.random.normal(kx, (B, C, p1, p2), dtype=jnp.float32)

    # Deterministic parameter init (uniform, PyTorch-Linear-style bounds).
    lim1 = 1.0 / jnp.sqrt(p1)
    lim2 = 1.0 / jnp.sqrt(p2)
    w1 = jax.random.uniform(k1, (prediction_length, p1), jnp.float32, -lim1, lim1)
    b1 = jax.random.uniform(k2, (prediction_length,), jnp.float32, -lim1, lim1)
    w2 = jax.random.uniform(k3, (input_size, p2), jnp.float32, -lim2, lim2)
    b2 = jax.random.uniform(k4, (input_size,), jnp.float32, -lim2, lim2)

    # ---- Hoisted weight fusion: done ONCE, outside the per-call hot path ----
    params = prepare_patch_map_params(w1, b1, w2, b2)

    # Per-call hot path: just reshape + one pallas_call (jitted into one executable).
    apply_fn = jax.jit(lambda xx: mlp_patch_map_fused(xx, params))
    out = jax.block_until_ready(apply_fn(x))

    ref = reference(x, w1, b1, w2, b2)
    assert out.shape == (B, C, prediction_length, input_size)
    assert jnp.allclose(out, ref, atol=2e-5, rtol=2e-5)

    # Also exercise the VMEM-gated two-matmul fallback path once.
    out2 = jax.block_until_ready(
        mlp_patch_map(x, w1, b1, w2, b2, force_two_stage=True))
    assert jnp.allclose(out2, ref, atol=2e-5, rtol=2e-5)

    print("KERNEL_OK")
</pallas_src>

<mosaic_0001>
module attributes {stable_mosaic.version = 11 : i64} {
  func.func @_fused_patch_map_kernel(%arg0: i32, %arg1: memref<8x32xf32, #tpu.memory_space<vmem>>, %arg2: memref<32x128xf32, #tpu.memory_space<vmem>>, %arg3: memref<1x128xf32, #tpu.memory_space<vmem>>, %arg4: memref<8x128xf32, #tpu.memory_space<vmem>>) attributes {dimension_semantics = [#tpu.dimension_semantics<parallel>], iteration_bounds = array<i64: 1>, scalar_prefetch = 0 : i64, scratch_operands = 0 : i64, tpu.core_type = #tpu.core_type<tc>, window_params = [{transform_indices = @transform_0, window_bounds = array<i64: 8, 32>}, {pipeline_mode = #tpu.pipeline_mode<synchronous>, transform_indices = @transform_1, window_bounds = array<i64: 32, 128>}, {pipeline_mode = #tpu.pipeline_mode<synchronous>, transform_indices = @transform_2, window_bounds = array<i64: 1, 128>}, {transform_indices = @transform_3, window_bounds = array<i64: 8, 128>}]} {
    %c0 = arith.constant 0 : index
    %c0_0 = arith.constant 0 : index
    %0 = vector.load %arg1[%c0, %c0_0] : memref<8x32xf32, #tpu.memory_space<vmem>>, vector<8x32xf32>
    %c0_1 = arith.constant 0 : index
    %c0_2 = arith.constant 0 : index
    %1 = vector.load %arg2[%c0_1, %c0_2] : memref<32x128xf32, #tpu.memory_space<vmem>>, vector<32x128xf32>
    %cst = arith.constant dense<0.000000e+00> : vector<8x128xf32>
    %2 = tpu.matmul %0, %1, %cst {dimension_numbers = #tpu.dot_dimension_numbers<[1], [0], [0], [1], [0, 0, 1, 1], [], []>} : vector<8x32xf32>, vector<32x128xf32>, vector<8x128xf32> -> vector<8x128xf32>
    %c0_3 = arith.constant 0 : index
    %c0_4 = arith.constant 0 : index
    %3 = vector.load %arg3[%c0_3, %c0_4] : memref<1x128xf32, #tpu.memory_space<vmem>>, vector<1x128xf32>
    %4 = vector.broadcast %3 : vector<1x128xf32> to vector<8x128xf32>
    %5 = arith.addf %2, %4 : vector<8x128xf32>
    %c0_5 = arith.constant 0 : index
    %c0_6 = arith.constant 0 : index
    %6 = vector.load %arg4[%c0_5, %c0_6] : memref<8x128xf32, #tpu.memory_space<vmem>>, vector<8x128xf32>
    tpu.vector_store %arg4[%c0_5, %c0_6], %5 {strides = array<i32>} : memref<8x128xf32, #tpu.memory_space<vmem>>, vector<8x128xf32>,
    return
  }
  func.func @transform_0(%arg0: i32) -> (i32, i32) {
    %c0_i32 = arith.constant 0 : i32
    %c0_i32_0 = arith.constant 0 : i32
    return %arg0, %c0_i32 : i32, i32
  }
  func.func @transform_1(%arg0: i32) -> (i32, i32) {
    %c0_i32 = arith.constant 0 : i32
    %c0_i32_0 = arith.constant 0 : i32
    %c0_i32_1 = arith.constant 0 : i32
    return %c0_i32, %c0_i32_0 : i32, i32
  }
  func.func @transform_2(%arg0: i32) -> (i32, i32) {
    %c0_i32 = arith.constant 0 : i32
    %c0_i32_0 = arith.constant 0 : i32
    %c0_i32_1 = arith.constant 0 : i32
    return %c0_i32, %c0_i32_0 : i32, i32
  }
  func.func @transform_3(%arg0: i32) -> (i32, i32) {
    %c0_i32 = arith.constant 0 : i32
    %c0_i32_0 = arith.constant 0 : i32
    return %arg0, %c0_i32 : i32, i32
  }
}

</mosaic_0001>

<bundles_post_ra>
// kernel: _lambda_.1
= control target key start
LH: loop header
LB: loop body
LE: loop exit
PB: predicated region body
PF: predicated region fallthrough
CT: control target
= control target key end

     0   :  { %v132_v0 = vmov 0.0|0.0   ;;  %vm133_vm0 = vmmov 0   ;;  %v134_v4 = vmov 0.0   ;;  %vm26_vm1 = vcmask 261120   ;;  %s176_s1 = inlined_call_operand.vmem [shape: f32[32,128], index: 1, kind: input, shape index: {}]   ;;  %s177_s0 = inlined_call_operand.vmem [shape: f32[8,32], index: 0, kind: input, shape index: {}]   ;;  %s178_s2 = inlined_call_operand.vmem [shape: f32[1,128], index: 2, kind: input, shape index: {}]   ;;  %s179_s3 = inlined_call_operand.vmem [shape: f32[8,128], index: 3, kind: output, shape index: {}]  }
   0x1   :  { %123 = vmatprep.subr.bf16.mxu0 %v132_v0  ;;  %v15_v1 = vld [vmem:[%s176_s1] sm:$0xff]  ;;  %v16_v2 = vld [vmem:[%s176_s1 + $0x8] sm:$0xff]  ;;  %v17_v3 = vld [vmem:[%s176_s1 + $0x10] sm:$0xff]  ;;  %120 = vmatprep.mubr.msk.f32.mxu0 %vm133_vm0, %v134_v4 }
   0x2   :  { %v124_v5 = vpack.c.bf16 %v16_v2, %v15_v1  ;;  %v18_v6 = vld [vmem:[%s176_s1 + $0x18] sm:$0xff]  ;;  %v14_v8 = vld [vmem:[%s177_s0] sm:$0xff] }
   0x3   :  { %v127_v7 = vpack.c.bf16 %v18_v6, %v17_v3  ;;  %v105_v9 = vld [vmem:[%s178_s2] ss:$0 sm:$0xff] }
   0x4   :  { %125 = vmatpush3.bf16.msra.mxu0 %v124_v5 }
   0x5   :  { %126 = vmatprep.subr.bf16.mxu0 %v132_v0 }
   0x8   :  { %128 = vmatpush3.bf16.msra.mxu0 %v127_v7 }
   0xb   :  { %121 = vmatmul.mubr.msk.f32.vlgmr.msra.gmra.mrb[0].mxu0 %vm26_vm1, %v14_v8 }
  0xde   :  { %v96_v10 = vpop.f32.mrb[0].mxu0 }
  0xdf   :  { %v97_v11 = vadd.f32 %v105_v9, %v96_v10  ;;  %v122_v12 = vpop.f32.mrb[1].mxu0 }
  0xe1   :  { %100 = vst [vmem:[%s179_s3] sm:$0xff] %v97_v11 }

</bundles_post_ra>
